<compile_context>
chip_gen: v7x
topology: tpu7x:2x2x1
jax: 0.10.0
libtpu: 0.0.40
codegen_flags: <defaults>
</compile_context>

<pallas_src>
import functools

import jax
import jax.numpy as jnp
from jax.experimental import pallas as pl
from jax.experimental.pallas import tpu as pltpu


def _round_up(x, m):
    return ((x + m - 1) // m) * m


def _adaptive_node_kernel(x_ref, w_ref, b_ref, o_ref, *, compute_dtype):
    # x_ref: (TM, K) in x's dtype   w_ref: (K, TN) compute dtype
    # b_ref: (1, TN) f32            o_ref: (TM, TN) out dtype
    x = x_ref[...].astype(compute_dtype)          # in-kernel cast (no wrapper pass)
    acc = jnp.dot(x, w_ref[...], preferred_element_type=jnp.float32)
    acc = acc + b_ref[...]                        # f32 bias, broadcast over rows
    o_ref[...] = jnp.maximum(acc, 0.0).astype(o_ref.dtype)


def _adaptive_node_pallas(x, w, b2d, *, out_dtype, block_m, compute_dtype):
    B, K = x.shape
    Kw, F = w.shape
    assert K == Kw, f"last dim of x ({K}) must equal weight rows ({Kw})"
    out_dtype = x.dtype if out_dtype is None else out_dtype

    # ---- F (output-column) tiling: only for the fused-nodes case ----------
    if F >= 256 and F % 256 == 0:
        TN = 256            # matches v6e/v7x 2x256^2 MXU
    elif F >= 128 and F % 128 == 0:
        TN = 128            # matches v5e 4x128^2 MXU
    else:
        TN = F              # single small node: full-F block, masked vst

    # ---- batch tiling ------------------------------------------------------
    if B <= 8:
        TM = B                                   # one full block (no masking)
    else:
        # >= 2 grid steps when possible so v7x's two TensorCores both work;
        # cap at block_m for very large B.
        TM = min(block_m, _round_up(pl.cdiv(B, 2), 8))
    grid = (pl.cdiv(B, TM), pl.cdiv(F, TN))

    # ---- VMEM budget (double-buffered x + out, weight, bias) ---------------
    x_bytes = jnp.dtype(x.dtype).itemsize
    w_bytes = jnp.dtype(w.dtype).itemsize
    o_bytes = jnp.dtype(out_dtype).itemsize
    needed = (2 * TM * K * x_bytes + 2 * TM * TN * o_bytes
              + 2 * K * TN * w_bytes + 2 * TN * 4)
    vmem_limit = int(min(max(2 * needed, 32 << 20), 48 << 20))  # v7x-safe cap

    kernel = functools.partial(_adaptive_node_kernel, compute_dtype=compute_dtype)

    return pl.pallas_call(
        kernel,
        out_shape=jax.ShapeDtypeStruct((B, F), out_dtype),
        grid=grid,
        in_specs=[
            pl.BlockSpec((TM, K), lambda i, j: (i, 0)),   # activations (batch-tiled)
            pl.BlockSpec((K, TN), lambda i, j: (0, j)),   # weight (VMEM-resident per F tile)
            pl.BlockSpec((1, TN), lambda i, j: (0, j)),   # bias
        ],
        out_specs=pl.BlockSpec((TM, TN), lambda i, j: (i, j)),
        compiler_params=pltpu.CompilerParams(
            dimension_semantics=("parallel", "parallel"),  # TC sharding on v7x
            vmem_limit_bytes=vmem_limit,
        ),
    )(x, w, b2d)


class AdaptiveNodePallas:
    """Pallas port of AdaptiveNode: y = relu(x @ W + b), fused in one kernel.

    Weight/bias are cast and laid out once at construction time; only the
    activation flows through per-call processing.
    """

    def __init__(self, weight, bias, *, compute_dtype=jnp.bfloat16, block_m=2048):
        Kw, F = weight.shape
        assert bias.shape == (F,)
        self.compute_dtype = compute_dtype
        self.block_m = block_m
        self.w = jnp.asarray(weight, compute_dtype)             # cached, cast once
        self.b2d = jnp.asarray(bias, jnp.float32).reshape(1, F)  # cached, 2D once

    def __call__(self, x, *, out_dtype=None):
        # out_dtype=None -> inherit x.dtype (matches the f32 PyTorch module);
        # pass jnp.bfloat16 to halve the dominant HBM store stream.
        return _adaptive_node_pallas(
            x, self.w, self.b2d,
            out_dtype=out_dtype,
            block_m=self.block_m,
            compute_dtype=self.compute_dtype,
        )


if __name__ == "__main__":
    # Module hyperparameters (small, consistent with the forward).
    input_dim = 8
    feature_dim = 32
    batch = 4
    K = input_dim + feature_dim   # x's last dim must be input_dim + feature_dim

    key = jax.random.PRNGKey(0)
    kx, kw, kb, kx2 = jax.random.split(key, 4)

    # Deterministic "randn"-style parameter init (synthetic, no checkpoint).
    weight = jax.random.normal(kw, (K, feature_dim), dtype=jnp.float32)
    bias = jax.random.normal(kb, (feature_dim,), dtype=jnp.float32)
    x = jax.random.normal(kx, (batch, K), dtype=jnp.float32)

    node = AdaptiveNodePallas(weight, bias)

    # ---- small-batch call (single full block, f32 output = module default) -
    y = jax.block_until_ready(node(x))

    y_ref_bf16 = jnp.maximum(
        jnp.dot(x.astype(jnp.bfloat16), weight.astype(jnp.bfloat16),
                preferred_element_type=jnp.float32) + bias, 0.0)
    y_ref_f32 = jnp.maximum(x @ weight + bias, 0.0)

    assert y.shape == (batch, feature_dim)
    assert y.dtype == x.dtype
    assert jnp.allclose(y, y_ref_bf16, atol=1e-3, rtol=1e-3), \
        "mismatch vs bf16-matched reference"
    assert jnp.allclose(y, y_ref_f32, atol=1e-1, rtol=5e-2), \
        "mismatch vs f32 module reference"

    # ---- larger batch: exercises the 2-step grid + ragged last block,
    #      bf16 output store (the perf-recommended configuration) ------------
    batch2 = 40
    x2 = jax.random.normal(kx2, (batch2, K), dtype=jnp.float32)
    y2 = jax.block_until_ready(node(x2, out_dtype=jnp.bfloat16))
    y2_ref = jnp.maximum(x2 @ weight + bias, 0.0)
    assert y2.shape == (batch2, feature_dim)
    assert y2.dtype == jnp.bfloat16
    assert jnp.allclose(y2.astype(jnp.float32), y2_ref, atol=2e-1, rtol=3e-2), \
        "mismatch on tiled/ragged bf16-output path"

    print("KERNEL_OK")
</pallas_src>

<mosaic_0001>
module attributes {stable_mosaic.version = 11 : i64} {
  func.func @_adaptive_node_kernel(%arg0: i32, %arg1: i32, %arg2: memref<4x40xf32, #tpu.memory_space<vmem>>, %arg3: memref<40x32xbf16, #tpu.memory_space<vmem>>, %arg4: memref<1x32xf32, #tpu.memory_space<vmem>>, %arg5: memref<4x32xf32, #tpu.memory_space<vmem>>) attributes {dimension_semantics = [#tpu.dimension_semantics<parallel>, #tpu.dimension_semantics<parallel>], iteration_bounds = array<i64: 1, 1>, scalar_prefetch = 0 : i64, scratch_operands = 0 : i64, tpu.core_type = #tpu.core_type<tc>, window_params = [{transform_indices = @transform_0, window_bounds = array<i64: 4, 40>}, {transform_indices = @transform_1, window_bounds = array<i64: 40, 32>}, {transform_indices = @transform_2, window_bounds = array<i64: 1, 32>}, {transform_indices = @transform_3, window_bounds = array<i64: 4, 32>}]} {
    %c0 = arith.constant 0 : index
    %c0_0 = arith.constant 0 : index
    %0 = vector.load %arg2[%c0, %c0_0] : memref<4x40xf32, #tpu.memory_space<vmem>>, vector<4x40xf32>
    %1 = arith.truncf %0 : vector<4x40xf32> to vector<4x40xbf16>
    %c0_1 = arith.constant 0 : index
    %c0_2 = arith.constant 0 : index
    %2 = vector.load %arg3[%c0_1, %c0_2] : memref<40x32xbf16, #tpu.memory_space<vmem>>, vector<40x32xbf16>
    %cst = arith.constant dense<0.000000e+00> : vector<4x32xf32>
    %3 = tpu.matmul %1, %2, %cst {dimension_numbers = #tpu.dot_dimension_numbers<[1], [0], [0], [1], [0, 0, 1, 1], [], []>} : vector<4x40xbf16>, vector<40x32xbf16>, vector<4x32xf32> -> vector<4x32xf32>
    %c0_3 = arith.constant 0 : index
    %c0_4 = arith.constant 0 : index
    %4 = vector.load %arg4[%c0_3, %c0_4] : memref<1x32xf32, #tpu.memory_space<vmem>>, vector<1x32xf32>
    %5 = vector.broadcast %4 : vector<1x32xf32> to vector<4x32xf32>
    %6 = arith.addf %3, %5 : vector<4x32xf32>
    %cst_5 = arith.constant 0.000000e+00 : f32
    %7 = vector.broadcast %cst_5 : f32 to vector<4x32xf32>
    %8 = arith.maximumf %6, %7 : vector<4x32xf32>
    %c0_6 = arith.constant 0 : index
    %c0_7 = arith.constant 0 : index
    %9 = vector.load %arg5[%c0_6, %c0_7] : memref<4x32xf32, #tpu.memory_space<vmem>>, vector<4x32xf32>
    tpu.vector_store %arg5[%c0_6, %c0_7], %8 {strides = array<i32>} : memref<4x32xf32, #tpu.memory_space<vmem>>, vector<4x32xf32>,
    return
  }
  func.func @transform_0(%arg0: i32, %arg1: i32) -> (i32, i32) {
    %c0_i32 = arith.constant 0 : i32
    %c0_i32_0 = arith.constant 0 : i32
    return %arg0, %c0_i32 : i32, i32
  }
  func.func @transform_1(%arg0: i32, %arg1: i32) -> (i32, i32) {
    %c0_i32 = arith.constant 0 : i32
    %c0_i32_0 = arith.constant 0 : i32
    return %c0_i32, %arg1 : i32, i32
  }
  func.func @transform_2(%arg0: i32, %arg1: i32) -> (i32, i32) {
    %c0_i32 = arith.constant 0 : i32
    %c0_i32_0 = arith.constant 0 : i32
    return %c0_i32, %arg1 : i32, i32
  }
  func.func @transform_3(%arg0: i32, %arg1: i32) -> (i32, i32) {
    %c0_i32 = arith.constant 0 : i32
    return %arg0, %arg1 : i32, i32
  }
}

</mosaic_0001>

<bundles_post_ra>
// kernel: tpu_custom_call.1
= control target key start
LH: loop header
LB: loop body
LE: loop exit
PB: predicated region body
PF: predicated region fallthrough
CT: control target
= control target key end

     0   :  { %v159_v1 = vmov 0.0   ;;  %vm160_vm0 = vmmov 0   ;;  %s209_s0 = inlined_call_operand.vmem [shape: f32[4,40], index: 0, kind: input, shape index: {}]   ;;  %s210_s1 = inlined_call_operand.vmem [shape: bf16[40,32], index: 1, kind: input, shape index: {}]   ;;  %s211_s2 = inlined_call_operand.vmem [shape: f32[1,32], index: 2, kind: input, shape index: {}]   ;;  %s212_s3 = inlined_call_operand.hbm [shape: f32[4,32], index: 3, kind: output, shape index: {}]  }
   0x1   :  { %v132_v0 = vld [vmem:[%s210_s1] sm:$0xff]   ;;  %119 = vmatprep.subr.bf16.mxu0 %v159_v1  ;;  %v133_v2 = vld [vmem:[%s210_s1 + $0x8] sm:$0xff]   ;;  %v134_v3 = vld [vmem:[%s210_s1 + $0x10] ss:$0 sps:$4 sm:$0xff]   ;;  %125 = vmatprep.mubr.msk.bf16.mxu0 %vm160_vm0, %v159_v1 }
   0x2   :  { %120 = vmatpush3.bf16.msra.mxu0 %v132_v0 }
   0x3   :  { %121 = vmatprep.subr.bf16.mxu0 %v159_v1 }
   0x4   :  { %8 = vsyncpa [#allocation3], 0  ;;  %vm49_vm1 = vcmask 1043456   ;;  %v16_v4 = vld [vmem:[%s209_s0] sm:$0xf]  ;;  %vm45_vm2 = vcmask 326656  }
   0x5   :  { %v51_v5 = vsel %vm49_vm1, %v134_v3, 0  ;;  %v17_v6 = vpack.c.bf16 %v16_v4, %v16_v4  ;;  %v110_v7 = vld [vmem:[%s211_s2] ss:$0 sm:$0xff]  ;;  %s161_s1 = smov [#allocation2]   ;;  %vm94_vm3 = vcmask 257024  }
   0x6   :  { %122 = vmatpush3.bf16.msra.mxu0 %v133_v2  ;;  %s102_s22 = sshll.u32 %s161_s1, 4  ;;  %s103_s22 = int_to_ptr.vmem [resolvable:$true] %s102_s22 }
   0x7   :  { %123 = vmatprep.subr.bf16.mxu0 %v159_v1  ;;  %s135_s0 = scalar_lea.vmem %s103_s22, 64  ;;  %p140_p1 = scmp.lt.s32.totalorder %s103_s22, %s103_s22 }
   0x8   :  { %p136_p0 = scmp.ne.s32.totalorder %s103_s22, %s135_s0  ;;  %p141_p2 = scmp.lt.s32.totalorder %s135_s0, %s135_s0 }
   0xa   :  { %124 = vmatpush3.bf16.msra.mxu0 %v51_v5  ;;  %p142_p3 = por %p141_p2, %p140_p1 }
   0xc   :  { %p143_p4 = pnand %p142_p3, %p136_p0 }
   0xd   :  { %126 = vmatmul.mubr.msk.bf16.vlgmr.msra.gmra.mrb[0].mxu0 %vm45_vm2, %v17_v6 }
  0xe0   :  { %v87_v8 = vpop.f32.mrb[0].mxu0 }
  0xe1   :  { %v88_v9 = vadd.f32 %v110_v7, %v87_v8  ;;  %v127_v10 = vpop.f32.mrb[1].mxu0 }
  0xe2   :  { %v90_v11 = vpop.f32.mrb[2].mxu0 }
  0xe3   :  { %v93_v12 = vmax.f32 %v88_v9, 0.0  ;;  %v128_v13 = vpop.f32.mrb[3].mxu0 }
  0xe5   :  { %95 = vst.msk [vmem:[#allocation2] sm:$0xf] %vm94_vm3, %v93_v12 }
  0xe6   :  { %146 = shalt.err (!%p143_p4)
}
  0xe7   :  { %s147_s24 = scalar_lea.hbm %s212_s3, 64 }
  0xe8   :  { %p148_p5 = scmp.ne.s32.totalorder %s212_s3, %s147_s24  ;;  %p151_p6 = scmp.lt.u32.totalorder %s147_s24, %s212_s3 }
  0xea   :  { %p153_p7 = pnand %p151_p6, %p148_p5 }
  0xec   :  { %156 = shalt.err (!%p153_p7)
}
  0xed   :  { %105 = dma.vmem_to_hbm [thread:$0]  %s103_s22, 64, %s212_s3, [#allocation3]  }
  0xee   :  { %157 = dma.done.wait [#allocation3], 64  }
  0xef   :  { %158 = vsyncadd [#allocation3], 4294967232 }
  0xf0   :  { %109 = vsyncpa [#allocation3], 1 }

</bundles_post_ra>
